<compile_context>
chip_gen: v5e
topology: v5e:2x2
jax: 0.10.0
libtpu: 0.0.40
codegen_flags: <defaults>
</compile_context>

<pallas_src>
import functools

import jax
import jax.numpy as jnp
from jax import lax
from jax.experimental import pallas as pl
from jax.experimental.pallas import tpu as pltpu

LANES = 128
SUBLANES = 8
SLAB = SUBLANES * LANES          # 1024 elements per (8,128) vreg slab
TILE_SLABS = 256                 # 256 slabs -> 1 MiB (f32) per input block


def _msle_partial_sum_kernel(p_ref, t_ref, out_ref, *, n_slabs, tile_slabs,
                             penalty_weight):
    """Writes penalty_weight * partial_sum((log1p(t)-log1p(p))**2) per block."""
    i = pl.program_id(0)
    p = jnp.maximum(p_ref[...].astype(jnp.float32), 1e-7)
    t = jnp.maximum(t_ref[...].astype(jnp.float32), 1e-7)
    # TODO(synk): on v7x the two logs/elem can make the EUP slot binding; a
    # log((t+1)*reciprocal(p+1)) rewrite trades accuracy for EUP pressure.
    err = jnp.log(t + 1.0) - jnp.log(p + 1.0)
    sq = err * err
    # Mask slabs of the (possibly partial) trailing block that lie past the
    # real array (their contents are unspecified).
    slab_ids = i * tile_slabs + lax.broadcasted_iota(jnp.int32, sq.shape, 0)
    sq = jnp.where(slab_ids < n_slabs, sq, 0.0)
    # Reduce only along the leading (vreg-count) axis: pure VPU adds.
    out_ref[...] = jnp.float32(penalty_weight) * jnp.sum(
        sq, axis=0, keepdims=True)


def _msle_elementwise_kernel(p_ref, t_ref, out_ref, *, penalty_weight):
    """Per-element penalty_weight * squared log error (reduction='none')."""
    p = jnp.maximum(p_ref[...].astype(jnp.float32), 1e-7)
    t = jnp.maximum(t_ref[...].astype(jnp.float32), 1e-7)
    err = jnp.log(t + 1.0) - jnp.log(p + 1.0)
    out_ref[...] = (jnp.float32(penalty_weight) * (err * err)).astype(
        out_ref.dtype)


def _as_slabs(x):
    """Flatten to (n_slabs, 8, 128); free (no copy) when x.size % 1024 == 0."""
    flat = x.reshape(-1)
    pad = (-flat.shape[0]) % SLAB
    if pad:
        # Neutral pad value 1.0 -> zero contribution; both inputs padded alike.
        flat = jnp.pad(flat, (0, pad), constant_values=1.0)
    return flat.reshape(-1, SUBLANES, LANES)


@functools.partial(jax.jit, static_argnames=("penalty_weight", "reduction"))
def msle_loss(preds, target, penalty_weight=1.0, reduction="mean"):
    assert preds.shape == target.shape, "preds/target must have the same shape"
    if reduction not in ("mean", "sum", "none"):
        raise ValueError(f"unknown reduction: {reduction}")

    n_elems = preds.size
    p3 = _as_slabs(preds)
    t3 = _as_slabs(target)
    n_slabs = p3.shape[0]
    tile_slabs = min(TILE_SLABS, n_slabs)
    num_blocks = -(-n_slabs // tile_slabs)

    in_specs = [
        pl.BlockSpec((tile_slabs, SUBLANES, LANES), lambda i: (i, 0, 0)),
        pl.BlockSpec((tile_slabs, SUBLANES, LANES), lambda i: (i, 0, 0)),
    ]

    if reduction == "none":
        out3 = pl.pallas_call(
            functools.partial(_msle_elementwise_kernel,
                              penalty_weight=float(penalty_weight)),
            out_shape=jax.ShapeDtypeStruct((n_slabs, SUBLANES, LANES),
                                           preds.dtype),
            grid_spec=pltpu.PrefetchScalarGridSpec(
                num_scalar_prefetch=0,
                grid=(num_blocks,),
                in_specs=in_specs,
                out_specs=pl.BlockSpec((tile_slabs, SUBLANES, LANES),
                                       lambda i: (i, 0, 0)),
            ),
            compiler_params=pltpu.CompilerParams(
                dimension_semantics=("parallel",)),
        )(p3, t3)
        flat = out3.reshape(-1)
        if flat.shape[0] != n_elems:
            flat = flat[:n_elems]
        return flat.reshape(preds.shape)

    # 'mean' / 'sum': lane-dense per-block partial sums, final reduce in XLA.
    partials = pl.pallas_call(
        functools.partial(_msle_partial_sum_kernel,
                          n_slabs=n_slabs, tile_slabs=tile_slabs,
                          penalty_weight=float(penalty_weight)),
        out_shape=jax.ShapeDtypeStruct((num_blocks, SUBLANES, LANES),
                                       jnp.float32),
        grid_spec=pltpu.PrefetchScalarGridSpec(
            num_scalar_prefetch=0,
            grid=(num_blocks,),
            in_specs=in_specs,
            out_specs=pl.BlockSpec((1, SUBLANES, LANES), lambda i: (i, 0, 0)),
        ),
        compiler_params=pltpu.CompilerParams(
            dimension_semantics=("parallel",)),
    )(p3, t3)

    total = jnp.sum(partials)
    if reduction == "mean":
        total = total / jnp.float32(n_elems)
    return total.astype(preds.dtype)


def _reference(preds, target, penalty_weight=1.0, reduction="mean"):
    p = jnp.maximum(preds.astype(jnp.float32), 1e-7)
    t = jnp.maximum(target.astype(jnp.float32), 1e-7)
    sq = (jnp.log(t + 1.0) - jnp.log(p + 1.0)) ** 2
    if reduction == "mean":
        out = sq.mean()
    elif reduction == "sum":
        out = sq.sum()
    else:
        out = sq
    return penalty_weight * out


if __name__ == "__main__":
    key = jax.random.PRNGKey(0)
    k1, k2, k3, k4 = jax.random.split(key, 4)

    # Primary NCHW shape, numel multiple of 1024 -> zero-copy slab view.
    shape = (2, 4, 16, 16)
    preds = jax.random.uniform(k1, shape, dtype=jnp.float32) * 5.0
    target = jax.random.uniform(k2, shape, dtype=jnp.float32) * 5.0
    penalty_weight = 1.0

    out_mean = jax.block_until_ready(
        msle_loss(preds, target, penalty_weight=penalty_weight,
                  reduction="mean"))
    ref_mean = _reference(preds, target, penalty_weight, "mean")
    assert jnp.allclose(out_mean, ref_mean, rtol=1e-5, atol=1e-6), (
        out_mean, ref_mean)

    out_sum = jax.block_until_ready(
        msle_loss(preds, target, penalty_weight=penalty_weight,
                  reduction="sum"))
    ref_sum = _reference(preds, target, penalty_weight, "sum")
    assert jnp.allclose(out_sum, ref_sum, rtol=1e-5, atol=1e-5), (
        out_sum, ref_sum)

    out_none = jax.block_until_ready(
        msle_loss(preds, target, penalty_weight=penalty_weight,
                  reduction="none"))
    ref_none = _reference(preds, target, penalty_weight, "none")
    assert out_none.shape == shape
    assert jnp.allclose(out_none, ref_none, rtol=1e-5, atol=1e-6)

    # Ragged shape (numel not a multiple of 1024) exercises the padding path.
    rshape = (2, 3, 15, 17)
    rp = jax.random.uniform(k3, rshape, dtype=jnp.float32) * 5.0
    rt = jax.random.uniform(k4, rshape, dtype=jnp.float32) * 5.0
    r_mean = jax.block_until_ready(
        msle_loss(rp, rt, penalty_weight=2.0, reduction="mean"))
    r_ref = _reference(rp, rt, 2.0, "mean")
    assert jnp.allclose(r_mean, r_ref, rtol=1e-5, atol=1e-6), (r_mean, r_ref)
    r_none = jax.block_until_ready(
        msle_loss(rp, rt, penalty_weight=2.0, reduction="none"))
    assert r_none.shape == rshape
    assert jnp.allclose(r_none, _reference(rp, rt, 2.0, "none"),
                        rtol=1e-5, atol=1e-6)

    print("KERNEL_OK")
</pallas_src>

<mosaic_0001>
module attributes {stable_mosaic.version = 11 : i64} {
  func.func @_msle_partial_sum_kernel(%arg0: i32, %arg1: memref<2x8x128xf32, #tpu.memory_space<vmem>>, %arg2: memref<2x8x128xf32, #tpu.memory_space<vmem>>, %arg3: memref<1x8x128xf32, #tpu.memory_space<vmem>>) attributes {dimension_semantics = [#tpu.dimension_semantics<parallel>], iteration_bounds = array<i64: 1>, scalar_prefetch = 0 : i64, scratch_operands = 0 : i64, tpu.core_type = #tpu.core_type<tc>, window_params = [{transform_indices = @transform_0, window_bounds = array<i64: 2, 8, 128>}, {transform_indices = @transform_1, window_bounds = array<i64: 2, 8, 128>}, {transform_indices = @transform_2, window_bounds = array<i64: 1, 8, 128>}]} {
    %c0 = arith.constant 0 : index
    %c0_0 = arith.constant 0 : index
    %c0_1 = arith.constant 0 : index
    %0 = vector.load %arg1[%c0, %c0_0, %c0_1] : memref<2x8x128xf32, #tpu.memory_space<vmem>>, vector<2x8x128xf32>
    %cst = arith.constant 1.000000e-07 : f32
    %1 = vector.broadcast %cst : f32 to vector<2x8x128xf32>
    %2 = arith.maximumf %0, %1 : vector<2x8x128xf32>
    %c0_2 = arith.constant 0 : index
    %c0_3 = arith.constant 0 : index
    %c0_4 = arith.constant 0 : index
    %3 = vector.load %arg2[%c0_2, %c0_3, %c0_4] : memref<2x8x128xf32, #tpu.memory_space<vmem>>, vector<2x8x128xf32>
    %cst_5 = arith.constant 1.000000e-07 : f32
    %4 = vector.broadcast %cst_5 : f32 to vector<2x8x128xf32>
    %5 = arith.maximumf %3, %4 : vector<2x8x128xf32>
    %cst_6 = arith.constant 1.000000e+00 : f32
    %6 = vector.broadcast %cst_6 : f32 to vector<2x8x128xf32>
    %7 = arith.addf %5, %6 : vector<2x8x128xf32>
    %8 = math.log %7 : vector<2x8x128xf32>
    %cst_7 = arith.constant 1.000000e+00 : f32
    %9 = vector.broadcast %cst_7 : f32 to vector<2x8x128xf32>
    %10 = arith.addf %2, %9 : vector<2x8x128xf32>
    %11 = math.log %10 : vector<2x8x128xf32>
    %12 = arith.subf %8, %11 : vector<2x8x128xf32>
    %13 = arith.mulf %12, %12 : vector<2x8x128xf32>
    %c2_i32 = arith.constant 2 : i32
    %14 = arith.muli %arg0, %c2_i32 : i32
    %15 = tpu.iota {dimensions = array<i32: 0>} : vector<2x8x128xi32>
    %16 = vector.broadcast %14 : i32 to vector<2x8x128xi32>
    %17 = arith.addi %16, %15 : vector<2x8x128xi32>
    %c2_i32_8 = arith.constant 2 : i32
    %18 = vector.broadcast %c2_i32_8 : i32 to vector<2x8x128xi32>
    %19 = arith.cmpi slt, %17, %18 : vector<2x8x128xi32>
    %cst_9 = arith.constant 0.000000e+00 : f32
    %20 = vector.broadcast %cst_9 : f32 to vector<2x8x128xf32>
    %21 = arith.select %19, %13, %20 : vector<2x8x128xi1>, vector<2x8x128xf32>
    %cst_10 = arith.constant dense<0.000000e+00> : vector<8x128xf32>
    %22 = vector.multi_reduction <add>, %21, %cst_10 [0] : vector<2x8x128xf32> to vector<8x128xf32>
    %23 = vector.shape_cast %22 : vector<8x128xf32> to vector<1x8x128xf32>
    %cst_11 = arith.constant 1.000000e+00 : f32
    %24 = vector.broadcast %cst_11 : f32 to vector<1x8x128xf32>
    %25 = arith.mulf %24, %23 : vector<1x8x128xf32>
    %c0_12 = arith.constant 0 : index
    %c0_13 = arith.constant 0 : index
    %c0_14 = arith.constant 0 : index
    %26 = vector.load %arg3[%c0_12, %c0_13, %c0_14] : memref<1x8x128xf32, #tpu.memory_space<vmem>>, vector<1x8x128xf32>
    tpu.vector_store %arg3[%c0_12, %c0_13, %c0_14], %25 {strides = array<i32>} : memref<1x8x128xf32, #tpu.memory_space<vmem>>, vector<1x8x128xf32>,
    return
  }
  func.func @transform_0(%arg0: i32) -> (i32, i32, i32) {
    %c0_i32 = arith.constant 0 : i32
    %c0_i32_0 = arith.constant 0 : i32
    %c0_i32_1 = arith.constant 0 : i32
    return %arg0, %c0_i32, %c0_i32_0 : i32, i32, i32
  }
  func.func @transform_1(%arg0: i32) -> (i32, i32, i32) {
    %c0_i32 = arith.constant 0 : i32
    %c0_i32_0 = arith.constant 0 : i32
    %c0_i32_1 = arith.constant 0 : i32
    return %arg0, %c0_i32, %c0_i32_0 : i32, i32, i32
  }
  func.func @transform_2(%arg0: i32) -> (i32, i32, i32) {
    %c0_i32 = arith.constant 0 : i32
    %c0_i32_0 = arith.constant 0 : i32
    %c0_i32_1 = arith.constant 0 : i32
    return %arg0, %c0_i32, %c0_i32_0 : i32, i32, i32
  }
}

</mosaic_0001>

<bundles_post_ra>
// kernel: msle_loss.1
= control target key start
LH: loop header
LB: loop body
LE: loop exit
PB: predicated region body
PF: predicated region fallthrough
CT: control target
= control target key end

     0   :  { %s86_s0 = inlined_call_operand.vmem [shape: f32[2,8,128], index: 0, kind: input, shape index: {}]   ;;  %s87_s1 = inlined_call_operand.vmem [shape: f32[2,8,128], index: 1, kind: input, shape index: {}]   ;;  %s88_s2 = inlined_call_operand.vmem [shape: f32[1,8,128], index: 2, kind: output, shape index: {}]  }
   0x1   :  { %v11_v0 = vld [vmem:[%s86_s0] sm:$0xff]  ;;  %v12_v1 = vld [vmem:[%s86_s0 + $0x8] sm:$0xff] }
   0x2   :  { %v15_v2 = vld [vmem:[%s87_s1] sm:$0xff]  ;;  %v13_v3 = vmax.f32 %v11_v0, 1e-07  ;;  %v14_v4 = vmax.f32 %v12_v1, 1e-07  ;;  %v16_v5 = vld [vmem:[%s87_s1 + $0x8] sm:$0xff] }
   0x3   :  { %v17_v6 = vmax.f32 %v15_v2, 1e-07  ;;  %v18_v7 = vmax.f32 %v16_v5, 1e-07 }
   0x4   :  { %v25_v8 = vadd.f32 1.0, %v13_v3  ;;  %v26_v11 = vadd.f32 1.0, %v14_v4 }
   0x5   :  { %v19_v9 = vadd.f32 1.0, %v17_v6  ;;  %v20_v10 = vadd.f32 1.0, %v18_v7 }
   0x6   :  { %48 = vlog2.f32 %v25_v8 }
   0x7   :  { %50 = vlog2.f32 %v19_v9 }
   0x8   :  { %52 = vlog2.f32 %v20_v10 }
   0x9   :  { %54 = vlog2.f32 %v26_v11 }
   0xc   :  { %v49_v12 = vpop.eup %48 }
   0xd   :  { %v51_v13 = vpop.eup %50  ;;  %v28_v14 = vmul.f32 0.6931472, %v49_v12 }
   0xe   :  { %v53_v15 = vpop.eup %52  ;;  %v22_v16 = vmul.f32 0.6931472, %v51_v13 }
   0xf   :  { %v55_v17 = vpop.eup %54  ;;  %v24_v18 = vmul.f32 0.6931472, %v53_v15 }
  0x10   :  { %v30_v19 = vmul.f32 0.6931472, %v55_v17  ;;  %v31_v20 = vsub.f32 %v22_v16, %v28_v14 }
  0x12   :  { %v32_v21 = vsub.f32 %v24_v18, %v30_v19  ;;  %v33_v22 = vmul.f32 %v31_v20, %v31_v20 }
  0x14   :  { %v34_v23 = vmul.f32 %v32_v21, %v32_v21 }
  0x16   :  { %v42_v24 = vadd.f32 %v34_v23, %v33_v22 }
  0x18   :  { %43 = vst [vmem:[%s88_s2] sm:$0xff] %v42_v24 }

</bundles_post_ra>
